<compile_context>
chip_gen: v5e
topology: v5e:2x2
jax: 0.10.0
libtpu: 0.0.40
codegen_flags: <defaults>
</compile_context>

<pallas_src>
import functools

import jax
import jax.numpy as jnp
from jax.experimental import pallas as pl
from jax.experimental.pallas import tpu as pltpu

_LANE = 128          # lane width (last dim)
_SUBLANE_BF16 = 16   # bf16 sublane packing (second-to-last dim)


def _round_up(x: int, m: int) -> int:
    return (x + m - 1) // m * m


def _cdiv(a: int, b: int) -> int:
    return (a + b - 1) // b


def _vmem_physical_bytes() -> int:
    """Physical VMEM of the current chip; conservative fallback if unknown."""
    try:
        info = pltpu.get_tpu_info()
        cap = getattr(info, "vmem_capacity_bytes", None)
        if cap:
            return int(cap)
    except Exception:
        pass
    return 64 * 1024 * 1024  # assume the smallest (v7x-sized) VMEM


# ----------------------------- Pallas kernel -------------------------------
def _make_fused_mlp_kernel(num_layers: int):
    """Kernel computing the whole MLP on one (TM, D0_pad) activation tile.

    Ref layout: (x_ref, w0, b0, w1, b1, ..., w{L-1}, b{L-1}, o_ref).
    x is bf16; weights are (Din_pad, Dout_pad) bf16; biases are (1, Dout_pad) f32.
    """
    def kernel(x_ref, *refs):
        o_ref = refs[2 * num_layers]
        h = x_ref[...]                                   # (TM, D0_pad) bf16
        for i in range(num_layers):                      # statically unrolled
            w = refs[2 * i][...]                         # (Din_pad, Dout_pad) bf16
            b = refs[2 * i + 1][...]                     # (1, Dout_pad) f32
            # bf16 operands into the MXU, f32 accumulation.
            y = jnp.dot(h.astype(w.dtype), w,
                        preferred_element_type=jnp.float32)
            y = y + b                                    # f32 epilogue
            if i < num_layers - 1:
                y = jnp.maximum(y, 0.0)                  # ReLU between hidden layers
            h = y
        o_ref[...] = h.astype(o_ref.dtype)
    return kernel


def _const_spec(shape, single_buffer: bool) -> pl.BlockSpec:
    """BlockSpec for a grid-invariant (VMEM-resident) operand."""
    index_map = lambda i: (0,) * len(shape)
    if single_buffer:
        # Constant index_map -> the operand never changes across grid steps,
        # so a single buffer suffices (halves resident weight VMEM).
        return pl.BlockSpec(shape, index_map, pipeline_mode=pl.Buffered(1))
    return pl.BlockSpec(shape, index_map)


# ------------------------------- FCNet glue --------------------------------
def init_fcnet_params(layer_dims, key, *, mxu_dtype=jnp.bfloat16):
    """Init mimicking torch.nn.Linear defaults (uniform +/- 1/sqrt(fan_in)).

    Weights are stored pre-transposed to (fan_in, fan_out), zero-padded to
    lane multiples, and cast to bf16 for the MXU; biases stay f32.  Zero
    padding keeps padded activation lanes identically zero through the whole
    network, so results in the real lanes are exact.
    """
    # TODO(synk): batch_norm=True path (nn.BatchNorm1d) not implemented; default is False.
    # TODO(synk): no streamed (K/N-tiled) fallback for layers too wide to keep
    #             all weights VMEM-resident; such configs rely on vmem_limit.
    weights, biases = [], []
    L = len(layer_dims) - 1
    for i in range(L):
        fan_in, fan_out = int(layer_dims[i]), int(layer_dims[i + 1])
        key, kw, kb = jax.random.split(key, 3)
        bound = 1.0 / (fan_in ** 0.5)
        w = jax.random.uniform(kw, (fan_in, fan_out), jnp.float32, -bound, bound)
        b = jax.random.uniform(kb, (fan_out,), jnp.float32, -bound, bound)
        din_p, dout_p = _round_up(fan_in, _LANE), _round_up(fan_out, _LANE)
        w_pad = jnp.zeros((din_p, dout_p), mxu_dtype)
        w_pad = w_pad.at[:fan_in, :fan_out].set(w.astype(mxu_dtype))
        b_pad = jnp.zeros((1, dout_p), jnp.float32).at[0, :fan_out].set(b)
        weights.append(w_pad)
        biases.append(b_pad)
    return {"layer_dims": tuple(int(d) for d in layer_dims),
            "weights": weights, "biases": biases}


@functools.partial(jax.jit,
                   static_argnames=("layer_dims", "tm_max", "single_buffer_weights"))
def _fcnet_forward_impl(weights, biases, x, *, layer_dims, tm_max,
                        single_buffer_weights):
    L = len(layer_dims) - 1
    assert L >= 1
    B, din = x.shape
    assert din == layer_dims[0], (din, layer_dims)

    din0_p = _round_up(din, _LANE)
    dout_last = layer_dims[-1]
    dout_last_p = _round_up(dout_last, _LANE)

    # --- Batch tiling: prefer >= 2 grid steps so v7x megacore shards rows. ---
    align = _SUBLANE_BF16
    b_aligned = _round_up(B, align)
    tm_cap = max(_round_up(min(int(tm_max), b_aligned), align), align)
    if b_aligned <= tm_cap:
        if b_aligned >= 2 * align:
            tm = _round_up(_cdiv(b_aligned, 2), align)   # 2 steps -> both TCs busy
        else:
            tm = b_aligned
    else:
        tm = tm_cap
    b_pad = _round_up(b_aligned, tm)
    grid = (b_pad // tm,)

    # --- Input activations in bf16 (halves activation DMA bytes). -----------
    x_bf16 = x.astype(jnp.bfloat16)
    if B == b_pad and din == din0_p:
        x_p = x_bf16                      # already aligned: skip the pad copy
    else:
        x_p = jnp.zeros((b_pad, din0_p), jnp.bfloat16).at[:B, :din].set(x_bf16)

    # --- Specs, cost estimate, VMEM budget. ----------------------------------
    in_specs = [pl.BlockSpec((tm, din0_p), lambda i: (i, 0))]
    inputs = [x_p]

    nbuf_w = 1 if single_buffer_weights else 2
    flops = 0
    bytes_accessed = x_p.size * 2 + b_pad * dout_last_p * 4
    vmem_bytes = 2 * tm * din0_p * 2 + 2 * tm * dout_last_p * 4  # act in/out tiles
    act_peak = 0
    for w, b in zip(weights, biases):
        in_specs.append(_const_spec(w.shape, single_buffer_weights))
        in_specs.append(_const_spec(b.shape, single_buffer_weights))
        inputs.extend([w, b])
        flops += 2 * b_pad * w.shape[0] * w.shape[1]
        bytes_accessed += w.size * w.dtype.itemsize + b.size * 4
        vmem_bytes += nbuf_w * (w.size * w.dtype.itemsize + b.size * 4)
        act_peak = max(act_peak, tm * (w.shape[0] + w.shape[1]) * 4)
    vmem_bytes += act_peak

    physical = _vmem_physical_bytes()
    cap = physical * 4 // 5                      # headroom for Mosaic scratch
    vmem_limit = int(min(max(vmem_bytes * 5 // 4, 16 * 1024 * 1024), cap))

    out = pl.pallas_call(
        _make_fused_mlp_kernel(L),
        out_shape=jax.ShapeDtypeStruct((b_pad, dout_last_p), jnp.float32),
        grid_spec=pltpu.PrefetchScalarGridSpec(
            num_scalar_prefetch=0,
            grid=grid,
            in_specs=in_specs,
            out_specs=pl.BlockSpec((tm, dout_last_p), lambda i: (i, 0)),
        ),
        compiler_params=pltpu.CompilerParams(
            dimension_semantics=("parallel",),
            vmem_limit_bytes=vmem_limit,
        ),
        cost_estimate=pl.CostEstimate(
            flops=flops, transcendentals=0, bytes_accessed=bytes_accessed),
    )(*inputs)

    # Slice away batch/lane padding (padded lanes are exactly zero).
    return out[:B, :dout_last]


_BUFFERED1_SUPPORTED = None  # lazily probed: does this jax accept pl.Buffered(1)?


def fcnet_forward(params, x, *, tm_max: int = 512):
    """FCNet.forward: fused Linear/ReLU stack. Returns (B, layer_dims[-1]) f32."""
    global _BUFFERED1_SUPPORTED
    weights = tuple(params["weights"])
    biases = tuple(params["biases"])
    layer_dims = params["layer_dims"]
    if _BUFFERED1_SUPPORTED is None:
        try:
            out = _fcnet_forward_impl(weights, biases, x, layer_dims=layer_dims,
                                      tm_max=tm_max, single_buffer_weights=True)
            jax.block_until_ready(out)
            _BUFFERED1_SUPPORTED = True
            return out
        except Exception:
            _BUFFERED1_SUPPORTED = False   # fall back to default double-buffering
    return _fcnet_forward_impl(weights, biases, x, layer_dims=layer_dims,
                               tm_max=tm_max,
                               single_buffer_weights=_BUFFERED1_SUPPORTED)


def fcnet_predict(params, x):
    """Net.predict: argmax over dim=1 of the forward pass (eval, no grad)."""
    return jnp.argmax(fcnet_forward(params, x), axis=1)


# --------------------------- pure-JAX reference -----------------------------
def _fcnet_reference(params, x):
    """Reference mirroring the kernel's bf16-MXU / f32-epilogue numerics."""
    layer_dims = params["layer_dims"]
    h = x.astype(jnp.float32)
    L = len(layer_dims) - 1
    for i, (w_pad, b_pad) in enumerate(zip(params["weights"], params["biases"])):
        din, dout = layer_dims[i], layer_dims[i + 1]
        w = w_pad[:din, :dout]
        b = b_pad[0, :dout]
        h = jnp.dot(h.astype(w.dtype), w, preferred_element_type=jnp.float32) + b
        if i < L - 1:
            h = jnp.maximum(h, 0.0)
    return h


if __name__ == "__main__":
    layer_dims = [16, 32, 64, 10]
    batch = 8

    key = jax.random.PRNGKey(0)
    kparams, kx = jax.random.split(key)
    params = init_fcnet_params(layer_dims, kparams)
    x = jax.random.normal(kx, (batch, layer_dims[0]), jnp.float32)

    logits = fcnet_forward(params, x)
    preds = fcnet_predict(params, x)
    jax.block_until_ready((logits, preds))

    assert logits.shape == (batch, layer_dims[-1])
    assert preds.shape == (batch,)

    ref = _fcnet_reference(params, x)
    assert jnp.allclose(logits, ref, atol=5e-2, rtol=5e-2), "mismatch vs reference"
    assert jnp.array_equal(preds, jnp.argmax(ref, axis=1)), "argmax mismatch"

    # Second config: non-multiple-of-16 batch exercising a multi-step grid.
    x2 = jax.random.normal(jax.random.PRNGKey(1), (20, layer_dims[0]), jnp.float32)
    logits2 = fcnet_forward(params, x2, tm_max=8)
    jax.block_until_ready(logits2)
    ref2 = _fcnet_reference(params, x2)
    assert logits2.shape == (20, layer_dims[-1])
    assert jnp.allclose(logits2, ref2, atol=5e-2, rtol=5e-2), "grid-path mismatch"

    print("KERNEL_OK")
</pallas_src>

<mosaic_0001>
module attributes {stable_mosaic.version = 11 : i64} {
  func.func @kernel(%arg0: i32, %arg1: memref<16x128xbf16, #tpu.memory_space<vmem>>, %arg2: memref<128x128xbf16, #tpu.memory_space<vmem>>, %arg3: memref<1x128xf32, #tpu.memory_space<vmem>>, %arg4: memref<128x128xbf16, #tpu.memory_space<vmem>>, %arg5: memref<1x128xf32, #tpu.memory_space<vmem>>, %arg6: memref<128x128xbf16, #tpu.memory_space<vmem>>, %arg7: memref<1x128xf32, #tpu.memory_space<vmem>>, %arg8: memref<16x128xf32, #tpu.memory_space<vmem>>) attributes {dimension_semantics = [#tpu.dimension_semantics<parallel>], iteration_bounds = array<i64: 1>, scalar_prefetch = 0 : i64, scratch_operands = 0 : i64, tpu.core_type = #tpu.core_type<tc>, window_params = [{transform_indices = @transform_0, window_bounds = array<i64: 16, 128>}, {pipeline_mode = #tpu.pipeline_mode<synchronous>, transform_indices = @transform_1, window_bounds = array<i64: 128, 128>}, {pipeline_mode = #tpu.pipeline_mode<synchronous>, transform_indices = @transform_2, window_bounds = array<i64: 1, 128>}, {pipeline_mode = #tpu.pipeline_mode<synchronous>, transform_indices = @transform_3, window_bounds = array<i64: 128, 128>}, {pipeline_mode = #tpu.pipeline_mode<synchronous>, transform_indices = @transform_4, window_bounds = array<i64: 1, 128>}, {pipeline_mode = #tpu.pipeline_mode<synchronous>, transform_indices = @transform_5, window_bounds = array<i64: 128, 128>}, {pipeline_mode = #tpu.pipeline_mode<synchronous>, transform_indices = @transform_6, window_bounds = array<i64: 1, 128>}, {transform_indices = @transform_7, window_bounds = array<i64: 16, 128>}]} {
    %c0 = arith.constant 0 : index
    %c0_0 = arith.constant 0 : index
    %0 = vector.load %arg1[%c0, %c0_0] : memref<16x128xbf16, #tpu.memory_space<vmem>>, vector<16x128xbf16>
    %c0_1 = arith.constant 0 : index
    %c0_2 = arith.constant 0 : index
    %1 = vector.load %arg2[%c0_1, %c0_2] : memref<128x128xbf16, #tpu.memory_space<vmem>>, vector<128x128xbf16>
    %c0_3 = arith.constant 0 : index
    %c0_4 = arith.constant 0 : index
    %2 = vector.load %arg3[%c0_3, %c0_4] : memref<1x128xf32, #tpu.memory_space<vmem>>, vector<1x128xf32>
    %cst = arith.constant dense<0.000000e+00> : vector<16x128xf32>
    %3 = tpu.matmul %0, %1, %cst {dimension_numbers = #tpu.dot_dimension_numbers<[1], [0], [0], [1], [0, 0, 1, 1], [], []>} : vector<16x128xbf16>, vector<128x128xbf16>, vector<16x128xf32> -> vector<16x128xf32>
    %4 = vector.broadcast %2 : vector<1x128xf32> to vector<16x128xf32>
    %5 = arith.addf %3, %4 : vector<16x128xf32>
    %cst_5 = arith.constant 0.000000e+00 : f32
    %6 = vector.broadcast %cst_5 : f32 to vector<16x128xf32>
    %7 = arith.maximumf %5, %6 : vector<16x128xf32>
    %c0_6 = arith.constant 0 : index
    %c0_7 = arith.constant 0 : index
    %8 = vector.load %arg4[%c0_6, %c0_7] : memref<128x128xbf16, #tpu.memory_space<vmem>>, vector<128x128xbf16>
    %c0_8 = arith.constant 0 : index
    %c0_9 = arith.constant 0 : index
    %9 = vector.load %arg5[%c0_8, %c0_9] : memref<1x128xf32, #tpu.memory_space<vmem>>, vector<1x128xf32>
    %10 = arith.truncf %7 : vector<16x128xf32> to vector<16x128xbf16>
    %cst_10 = arith.constant dense<0.000000e+00> : vector<16x128xf32>
    %11 = tpu.matmul %10, %8, %cst_10 {dimension_numbers = #tpu.dot_dimension_numbers<[1], [0], [0], [1], [0, 0, 1, 1], [], []>} : vector<16x128xbf16>, vector<128x128xbf16>, vector<16x128xf32> -> vector<16x128xf32>
    %12 = vector.broadcast %9 : vector<1x128xf32> to vector<16x128xf32>
    %13 = arith.addf %11, %12 : vector<16x128xf32>
    %cst_11 = arith.constant 0.000000e+00 : f32
    %14 = vector.broadcast %cst_11 : f32 to vector<16x128xf32>
    %15 = arith.maximumf %13, %14 : vector<16x128xf32>
    %c0_12 = arith.constant 0 : index
    %c0_13 = arith.constant 0 : index
    %16 = vector.load %arg6[%c0_12, %c0_13] : memref<128x128xbf16, #tpu.memory_space<vmem>>, vector<128x128xbf16>
    %c0_14 = arith.constant 0 : index
    %c0_15 = arith.constant 0 : index
    %17 = vector.load %arg7[%c0_14, %c0_15] : memref<1x128xf32, #tpu.memory_space<vmem>>, vector<1x128xf32>
    %18 = arith.truncf %15 : vector<16x128xf32> to vector<16x128xbf16>
    %cst_16 = arith.constant dense<0.000000e+00> : vector<16x128xf32>
    %19 = tpu.matmul %18, %16, %cst_16 {dimension_numbers = #tpu.dot_dimension_numbers<[1], [0], [0], [1], [0, 0, 1, 1], [], []>} : vector<16x128xbf16>, vector<128x128xbf16>, vector<16x128xf32> -> vector<16x128xf32>
    %20 = vector.broadcast %17 : vector<1x128xf32> to vector<16x128xf32>
    %21 = arith.addf %19, %20 : vector<16x128xf32>
    %c0_17 = arith.constant 0 : index
    %c0_18 = arith.constant 0 : index
    %22 = vector.load %arg8[%c0_17, %c0_18] : memref<16x128xf32, #tpu.memory_space<vmem>>, vector<16x128xf32>
    tpu.vector_store %arg8[%c0_17, %c0_18], %21 {strides = array<i32>} : memref<16x128xf32, #tpu.memory_space<vmem>>, vector<16x128xf32>,
    return
  }
  func.func @transform_0(%arg0: i32) -> (i32, i32) {
    %c0_i32 = arith.constant 0 : i32
    %c0_i32_0 = arith.constant 0 : i32
    return %arg0, %c0_i32 : i32, i32
  }
  func.func @transform_1(%arg0: i32) -> (i32, i32) {
    %c0_i32 = arith.constant 0 : i32
    %c0_i32_0 = arith.constant 0 : i32
    %c0_i32_1 = arith.constant 0 : i32
    return %c0_i32, %c0_i32_0 : i32, i32
  }
  func.func @transform_2(%arg0: i32) -> (i32, i32) {
    %c0_i32 = arith.constant 0 : i32
    %c0_i32_0 = arith.constant 0 : i32
    %c0_i32_1 = arith.constant 0 : i32
    return %c0_i32, %c0_i32_0 : i32, i32
  }
  func.func @transform_3(%arg0: i32) -> (i32, i32) {
    %c0_i32 = arith.constant 0 : i32
    %c0_i32_0 = arith.constant 0 : i32
    %c0_i32_1 = arith.constant 0 : i32
    return %c0_i32, %c0_i32_0 : i32, i32
  }
  func.func @transform_4(%arg0: i32) -> (i32, i32) {
    %c0_i32 = arith.constant 0 : i32
    %c0_i32_0 = arith.constant 0 : i32
    %c0_i32_1 = arith.constant 0 : i32
    return %c0_i32, %c0_i32_0 : i32, i32
  }
  func.func @transform_5(%arg0: i32) -> (i32, i32) {
    %c0_i32 = arith.constant 0 : i32
    %c0_i32_0 = arith.constant 0 : i32
    %c0_i32_1 = arith.constant 0 : i32
    return %c0_i32, %c0_i32_0 : i32, i32
  }
  func.func @transform_6(%arg0: i32) -> (i32, i32) {
    %c0_i32 = arith.constant 0 : i32
    %c0_i32_0 = arith.constant 0 : i32
    %c0_i32_1 = arith.constant 0 : i32
    return %c0_i32, %c0_i32_0 : i32, i32
  }
  func.func @transform_7(%arg0: i32) -> (i32, i32) {
    %c0_i32 = arith.constant 0 : i32
    %c0_i32_0 = arith.constant 0 : i32
    return %arg0, %c0_i32 : i32, i32
  }
}

module attributes {stable_mosaic.version = 11 : i64} {
  func.func @kernel(%arg0: i32, %arg1: memref<16x128xbf16, #tpu.memory_space<vmem>>, %arg2: memref<128x128xbf16, #tpu.memory_space<vmem>>, %arg3: memref<1x128xf32, #tpu.memory_space<vmem>>, %arg4: memref<128x128xbf16, #tpu.memory_space<vmem>>, %arg5: memref<1x128xf32, #tpu.memory_space<vmem>>, %arg6: memref<128x128xbf16, #tpu.memory_space<vmem>>, %arg7: memref<1x128xf32, #tpu.memory_space<vmem>>, %arg8: memref<16x128xf32, #tpu.memory_space<vmem>>) attributes {dimension_semantics = [#tpu.dimension_semantics<parallel>], iteration_bounds = array<i64: 1>, scalar_prefetch = 0 : i64, scratch_operands = 0 : i64, tpu.core_type = #tpu.core_type<tc>, window_params = [{transform_indices = @transform_0, window_bounds = array<i64: 16, 128>}, {pipeline_mode = #tpu.pipeline_mode<synchronous>, transform_indices = @transform_1, window_bounds = array<i64: 128, 128>}, {pipeline_mode = #tpu.pipeline_mode<synchronous>, transform_indices = @transform_2, window_bounds = array<i64: 1, 128>}, {pipeline_mode = #tpu.pipeline_mode<synchronous>, transform_indices = @transform_3, window_bounds = array<i64: 128, 128>}, {pipeline_mode = #tpu.pipeline_mode<synchronous>, transform_indices = @transform_4, window_bounds = array<i64: 1, 128>}, {pipeline_mode = #tpu.pipeline_mode<synchronous>, transform_indices = @transform_5, window_bounds = array<i64: 128, 128>}, {pipeline_mode = #tpu.pipeline_mode<synchronous>, transform_indices = @transform_6, window_bounds = array<i64: 1, 128>}, {transform_indices = @transform_7, window_bounds = array<i64: 16, 128>}]} {
    %c0 = arith.constant 0 : index
    %c0_0 = arith.constant 0 : index
    %0 = vector.load %arg1[%c0, %c0_0] : memref<16x128xbf16, #tpu.memory_space<vmem>>, vector<16x128xbf16>
    %c0_1 = arith.constant 0 : index
    %c0_2 = arith.constant 0 : index
    %1 = vector.load %arg2[%c0_1, %c0_2] : memref<128x128xbf16, #tpu.memory_space<vmem>>, vector<128x128xbf16>
    %c0_3 = arith.constant 0 : index
    %c0_4 = arith.constant 0 : index
    %2 = vector.load %arg3[%c0_3, %c0_4] : memref<1x128xf32, #tpu.memory_space<vmem>>, vector<1x128xf32>
    %cst = arith.constant dense<0.000000e+00> : vector<16x128xf32>
    %3 = tpu.matmul %0, %1, %cst {dimension_numbers = #tpu.dot_dimension_numbers<[1], [0], [0], [1], [0, 0, 1, 1], [], []>} : vector<16x128xbf16>, vector<128x128xbf16>, vector<16x128xf32> -> vector<16x128xf32>
    %4 = vector.broadcast %2 : vector<1x128xf32> to vector<16x128xf32>
    %5 = arith.addf %3, %4 : vector<16x128xf32>
    %cst_5 = arith.constant 0.000000e+00 : f32
    %6 = vector.broadcast %cst_5 : f32 to vector<16x128xf32>
    %7 = arith.maximumf %5, %6 : vector<16x128xf32>
    %c0_6 = arith.constant 0 : index
    %c0_7 = arith.constant 0 : index
    %8 = vector.load %arg4[%c0_6, %c0_7] : memref<128x128xbf16, #tpu.memory_space<vmem>>, vector<128x128xbf16>
    %c0_8 = arith.constant 0 : index
    %c0_9 = arith.constant 0 : index
    %9 = vector.load %arg5[%c0_8, %c0_9] : memref<1x128xf32, #tpu.memory_space<vmem>>, vector<1x128xf32>
    %10 = arith.truncf %7 : vector<16x128xf32> to vector<16x128xbf16>
    %cst_10 = arith.constant dense<0.000000e+00> : vector<16x128xf32>
    %11 = tpu.matmul %10, %8, %cst_10 {dimension_numbers = #tpu.dot_dimension_numbers<[1], [0], [0], [1], [0, 0, 1, 1], [], []>} : vector<16x128xbf16>, vector<128x128xbf16>, vector<16x128xf32> -> vector<16x128xf32>
    %12 = vector.broadcast %9 : vector<1x128xf32> to vector<16x128xf32>
    %13 = arith.addf %11, %12 : vector<16x128xf32>
    %cst_11 = arith.constant 0.000000e+00 : f32
    %14 = vector.broadcast %cst_11 : f32 to vector<16x128xf32>
    %15 = arith.maximumf %13, %14 : vector<16x128xf32>
    %c0_12 = arith.constant 0 : index
    %c0_13 = arith.constant 0 : index
    %16 = vector.load %arg6[%c0_12, %c0_13] : memref<128x128xbf16, #tpu.memory_space<vmem>>, vector<128x128xbf16>
    %c0_14 = arith.constant 0 : index
    %c0_15 = arith.constant 0 : index
    %17 = vector.load %arg7[%c0_14, %c0_15] : memref<1x128xf32, #tpu.memory_space<vmem>>, vector<1x128xf32>
    %18 = arith.truncf %15 : vector<16x128xf32> to vector<16x128xbf16>
    %cst_16 = arith.constant dense<0.000000e+00> : vector<16x128xf32>
    %19 = tpu.matmul %18, %16, %cst_16 {dimension_numbers = #tpu.dot_dimension_numbers<[1], [0], [0], [1], [0, 0, 1, 1], [], []>} : vector<16x128xbf16>, vector<128x128xbf16>, vector<16x128xf32> -> vector<16x128xf32>
    %20 = vector.broadcast %17 : vector<1x128xf32> to vector<16x128xf32>
    %21 = arith.addf %19, %20 : vector<16x128xf32>
    %c0_17 = arith.constant 0 : index
    %c0_18 = arith.constant 0 : index
    %22 = vector.load %arg8[%c0_17, %c0_18] : memref<16x128xf32, #tpu.memory_space<vmem>>, vector<16x128xf32>
    tpu.vector_store %arg8[%c0_17, %c0_18], %21 {strides = array<i32>} : memref<16x128xf32, #tpu.memory_space<vmem>>, vector<16x128xf32>,
    return
  }
  func.func @transform_0(%arg0: i32) -> (i32, i32) {
    %c0_i32 = arith.constant 0 : i32
    %c0_i32_0 = arith.constant 0 : i32
    return %arg0, %c0_i32 : i32, i32
  }
  func.func @transform_1(%arg0: i32) -> (i32, i32) {
    %c0_i32 = arith.constant 0 : i32
    %c0_i32_0 = arith.constant 0 : i32
    %c0_i32_1 = arith.constant 0 : i32
    return %c0_i32, %c0_i32_0 : i32, i32
  }
  func.func @transform_2(%arg0: i32) -> (i32, i32) {
    %c0_i32 = arith.constant 0 : i32
    %c0_i32_0 = arith.constant 0 : i32
    %c0_i32_1 = arith.constant 0 : i32
    return %c0_i32, %c0_i32_0 : i32, i32
  }
  func.func @transform_3(%arg0: i32) -> (i32, i32) {
    %c0_i32 = arith.constant 0 : i32
    %c0_i32_0 = arith.constant 0 : i32
    %c0_i32_1 = arith.constant 0 : i32
    return %c0_i32, %c0_i32_0 : i32, i32
  }
  func.func @transform_4(%arg0: i32) -> (i32, i32) {
    %c0_i32 = arith.constant 0 : i32
    %c0_i32_0 = arith.constant 0 : i32
    %c0_i32_1 = arith.constant 0 : i32
    return %c0_i32, %c0_i32_0 : i32, i32
  }
  func.func @transform_5(%arg0: i32) -> (i32, i32) {
    %c0_i32 = arith.constant 0 : i32
    %c0_i32_0 = arith.constant 0 : i32
    %c0_i32_1 = arith.constant 0 : i32
    return %c0_i32, %c0_i32_0 : i32, i32
  }
  func.func @transform_6(%arg0: i32) -> (i32, i32) {
    %c0_i32 = arith.constant 0 : i32
    %c0_i32_0 = arith.constant 0 : i32
    %c0_i32_1 = arith.constant 0 : i32
    return %c0_i32, %c0_i32_0 : i32, i32
  }
  func.func @transform_7(%arg0: i32) -> (i32, i32) {
    %c0_i32 = arith.constant 0 : i32
    %c0_i32_0 = arith.constant 0 : i32
    return %arg0, %c0_i32 : i32, i32
  }
}

</mosaic_0001>

<bundles_post_ra>
// kernel: _fcnet_forward_impl.1
= control target key start
LH: loop header
LB: loop body
LE: loop exit
PB: predicated region body
PF: predicated region fallthrough
CT: control target
= control target key end

     0   :  { %12 = vsyncpa [#allocation3], 0  ;;  %s622_s0 = inlined_call_operand.vmem [shape: bf16[16,128], index: 0, kind: input, shape index: {}]   ;;  %s623_s1 = inlined_call_operand.hbm [shape: bf16[128,128], index: 1, kind: input, shape index: {}]   ;;  %s624_s2 = inlined_call_operand.vmem [shape: f32[1,128], index: 2, kind: input, shape index: {}]   ;;  %s625_s3 = inlined_call_operand.hbm [shape: bf16[128,128], index: 3, kind: input, shape index: {}]   ;;  %s626_s4 = inlined_call_operand.vmem [shape: f32[1,128], index: 4, kind: input, shape index: {}]   ;;  %s627_s5 = inlined_call_operand.hbm [shape: bf16[128,128], index: 5, kind: input, shape index: {}]   ;;  %s628_s6 = inlined_call_operand.vmem [shape: f32[1,128], index: 6, kind: input, shape index: {}]   ;;  %s629_s7 = inlined_call_operand.vmem [shape: f32[16,128], index: 7, kind: output, shape index: {}]  }
   0x1   :  { %13 = vsyncpa [#allocation5], 0  ;;  %s35_s26 = sshll.u32 %s625_s3, 4  ;;  %s550_s27 = smov [#allocation4]   ;;  %s36_s26 = int_to_ptr.hbm [resolvable:$true] %s35_s26 }
   0x2   :  { %s37_s28 = sshll.u32 %s550_s27, 4  ;;  %s20_s8 = sshll.u32 %s623_s1, 4  ;;  %s38_s28 = int_to_ptr.vmem [resolvable:$true] %s37_s28  ;;  %s21_s8 = int_to_ptr.hbm [resolvable:$true] %s20_s8 }
   0x3   :  { %s551_s9 = smov 64   ;;  %s552_s10 = smov 4  }
   0x4   :  { %43 = dma.hbm_to_vmem [thread:$0]  %s36_s26, 1024, %s38_s28, [#allocation5], %s551_s9, %s551_s9, %s552_s10  }
   0x5   :  { %s553_s11 = smov [#allocation2]   ;;  %s50_s15 = sshll.u32 %s627_s5, 4  ;;  %s51_s15 = int_to_ptr.hbm [resolvable:$true] %s50_s15 }
   0x6   :  { %s22_s12 = sshll.u32 %s553_s11, 4  ;;  %s554_s3 = smov [#allocation6]   ;;  %s23_s12 = int_to_ptr.vmem [resolvable:$true] %s22_s12 }
   0x7   :  { %28 = dma.hbm_to_vmem [thread:$0]  %s21_s8, 1024, %s23_s12, [#allocation3], %s551_s9, %s551_s9, %s552_s10  }
   0x8   :  { %s52_s16 = sshll.u32 %s554_s3, 4  ;;  %s53_s16 = int_to_ptr.vmem [resolvable:$true] %s52_s16 }
   0x9   :  { %58 = dma.hbm_to_vmem [thread:$0]  %s51_s15, 1024, %s53_s16, [#allocation5], %s551_s9, %s551_s9, %s552_s10  }
   0xa   :  { %546 = dma.done.wait [#allocation3], 1024  }
   0xb   :  { %547 = vsyncadd [#allocation3], 4294966272 }
   0xc   :  { %548 = dma.done.wait [#allocation5], 2048  }
   0xd   :  { %549 = vsyncadd [#allocation5], 4294965248  ;;  %v449_v0 = vld [vmem:[#allocation2 + $0x38] sm:$0xff]  ;;  %v448_v1 = vld [vmem:[#allocation2 + $0x30] sm:$0xff] }
   0xe   :  { %149 = vmatpush.bf16.msra.mxu0 %v449_v0  ;;  %v457_v2 = vld [vmem:[#allocation4 + $0x38] sm:$0xff]  ;;  %v456_v3 = vld [vmem:[#allocation4 + $0x30] sm:$0xff]  ;;  %v447_v4 = vld [vmem:[#allocation2 + $0x28] sm:$0xff] }
   0xf   :  { %234 = vmatpush.bf16.msra.mxu1 %v457_v2  ;;  %v455_v5 = vld [vmem:[#allocation4 + $0x28] sm:$0xff]  ;;  %v446_v6 = vld [vmem:[#allocation2 + $0x20] sm:$0xff]  ;;  %v445_v8 = vld [vmem:[#allocation2 + $0x18] sm:$0xff] }
  0x10   :  { %v454_v7 = vld [vmem:[#allocation4 + $0x20] sm:$0xff]  ;;  %v444_v9 = vld [vmem:[#allocation2 + $0x10] sm:$0xff]  ;;  %v443_v10 = vld [vmem:[#allocation2 + $0x8] sm:$0xff] }
  0x11   :  { %v442_v11 = vld [vmem:[#allocation2] sm:$0xff]  ;;  %v453_v13 = vld [vmem:[#allocation4 + $0x18] sm:$0xff]  ;;  %v452_v14 = vld [vmem:[#allocation4 + $0x10] sm:$0xff] }
  0x12   :  { %150 = vmatpush.bf16.msra.mxu0 %v448_v1  ;;  %v441_v12 = vld [vmem:[%s622_s0] sm:$0xff]  ;;  %v451_v15 = vld [vmem:[#allocation4 + $0x8] sm:$0xff]  ;;  %v465_v17 = vld [vmem:[#allocation6 + $0x38] sm:$0xff] }
  0x13   :  { %235 = vmatpush.bf16.msra.mxu1 %v456_v3  ;;  %v450_v16 = vld [vmem:[#allocation4] sm:$0xff]  ;;  %319 = vmatpush.bf16.msra.mxu2 %v465_v17  ;;  %v464_v18 = vld [vmem:[#allocation6 + $0x30] sm:$0xff]  ;;  %v463_v19 = vld [vmem:[#allocation6 + $0x28] sm:$0xff] }
  0x14   :  { %v462_v20 = vld [vmem:[#allocation6 + $0x20] sm:$0xff]  ;;  %v461_v29 = vld [vmem:[#allocation6 + $0x18] sm:$0xff]  ;;  %v460_v30 = vld [vmem:[#allocation6 + $0x10] sm:$0xff] }
  0x15   :  { %v471_v22 = vld [vmem:[%s624_s2] ss:$0 sm:$0xff]  ;;  %v459_v31 = vld [vmem:[#allocation6 + $0x8] sm:$0xff] }
  0x16   :  { %151 = vmatpush.bf16.msra.mxu0 %v447_v4  ;;  %v458_v32 = vld [vmem:[#allocation6] sm:$0xff] }
  0x17   :  { %236 = vmatpush.bf16.msra.mxu1 %v455_v5  ;;  %320 = vmatpush.bf16.msra.mxu2 %v464_v18  ;;  %v472_v34 = vld [vmem:[%s626_s4] ss:$0 sm:$0xff] }
  0x18   :  { %v473_v41 = vld [vmem:[%s628_s6] ss:$0 sm:$0xff] }
  0x1a   :  { %152 = vmatpush.bf16.msra.mxu0 %v446_v6 }
  0x1b   :  { %237 = vmatpush.bf16.msra.mxu1 %v454_v7  ;;  %321 = vmatpush.bf16.msra.mxu2 %v463_v19 }
  0x1e   :  { %153 = vmatpush.bf16.msra.mxu0 %v445_v8 }
  0x1f   :  { %238 = vmatpush.bf16.msra.mxu1 %v453_v13  ;;  %322 = vmatpush.bf16.msra.mxu2 %v462_v20 }
  0x22   :  { %154 = vmatpush.bf16.msra.mxu0 %v444_v9 }
  0x23   :  { %239 = vmatpush.bf16.msra.mxu1 %v452_v14  ;;  %323 = vmatpush.bf16.msra.mxu2 %v461_v29 }
  0x26   :  { %155 = vmatpush.bf16.msra.mxu0 %v443_v10 }
  0x27   :  { %240 = vmatpush.bf16.msra.mxu1 %v451_v15  ;;  %324 = vmatpush.bf16.msra.mxu2 %v460_v30 }
  0x2a   :  { %156 = vmatpush.bf16.msra.mxu0 %v442_v11 }
  0x2b   :  { %241 = vmatpush.bf16.msra.mxu1 %v450_v16  ;;  %325 = vmatpush.bf16.msra.mxu2 %v459_v31 }
  0x2d   :  { %157 = vmatmul.bf16.vlgmr.msra.gmra.mxu0 %v441_v12 }
  0x2f   :  { %326 = vmatpush.bf16.msra.mxu2 %v458_v32 }
  0xaa   :  { %v158_v21 = vpop.f32.mrf.mxu0 }
  0xab   :  { %v159_v23 = vadd.f32 %v471_v22, %v158_v21 }
  0xad   :  { %v163_v26 = vmax.f32 %v159_v23, 0.0 }
  0xb2   :  { %v160_v24 = vpop.f32.mrf.mxu0 }
  0xb3   :  { %v161_v25 = vadd.f32 %v471_v22, %v160_v24 }
  0xb5   :  { %v164_v27 = vmax.f32 %v161_v25, 0.0 }
  0xb7   :  { %v182_v28 = vpack.c.bf16 %v164_v27, %v163_v26 }
  0xb9   :  { %242 = vmatmul.bf16.vlgmr.msra.gmra.mxu1 %v182_v28 }
 0x136   :  { %v243_v33 = vpop.f32.mrf.mxu1 }
 0x137   :  { %v244_v35 = vadd.f32 %v472_v34, %v243_v33 }
 0x139   :  { %v248_v38 = vmax.f32 %v244_v35, 0.0 }
 0x13e   :  { %v245_v36 = vpop.f32.mrf.mxu1 }
 0x13f   :  { %v246_v37 = vadd.f32 %v472_v34, %v245_v36 }
 0x141   :  { %v249_v39 = vmax.f32 %v246_v37, 0.0 }
 0x143   :  { %v267_v40 = vpack.c.bf16 %v249_v39, %v248_v38 }
 0x145   :  { %327 = vmatmul.bf16.vlgmr.msra.gmra.mxu2 %v267_v40 }
 0x1c8   :  { %v328_v42 = vpop.f32.mrf.mxu2 }
 0x1c9   :  { %v329_v43 = vadd.f32 %v473_v41, %v328_v42 }
 0x1cb   :  { %333 = vst [vmem:[%s629_s7] sm:$0xff] %v329_v43 }
 0x1d0   :  { %v330_v44 = vpop.f32.mrf.mxu2 }
 0x1d1   :  { %v331_v45 = vadd.f32 %v473_v41, %v330_v44 }
 0x1d3   :  { %334 = vst [vmem:[%s629_s7 + $0x8] sm:$0xff] %v331_v45 }
 0x1d4   :  { %339 = vsyncpa [#allocation3], 1 }
 0x1d5   :  { %340 = vsyncpa [#allocation5], 1 }

// kernel: _fcnet_forward_impl.1
= control target key start
LH: loop header
LB: loop body
LE: loop exit
PB: predicated region body
PF: predicated region fallthrough
CT: control target
= control target key end

     0   :  { %12 = vsyncpa [#allocation3], 0  ;;  %s622_s0 = inlined_call_operand.vmem [shape: bf16[16,128], index: 0, kind: input, shape index: {}]   ;;  %s623_s1 = inlined_call_operand.hbm [shape: bf16[128,128], index: 1, kind: input, shape index: {}]   ;;  %s624_s2 = inlined_call_operand.vmem [shape: f32[1,128], index: 2, kind: input, shape index: {}]   ;;  %s625_s3 = inlined_call_operand.hbm [shape: bf16[128,128], index: 3, kind: input, shape index: {}]   ;;  %s626_s4 = inlined_call_operand.vmem [shape: f32[1,128], index: 4, kind: input, shape index: {}]   ;;  %s627_s5 = inlined_call_operand.hbm [shape: bf16[128,128], index: 5, kind: input, shape index: {}]   ;;  %s628_s6 = inlined_call_operand.vmem [shape: f32[1,128], index: 6, kind: input, shape index: {}]   ;;  %s629_s7 = inlined_call_operand.vmem [shape: f32[16,128], index: 7, kind: output, shape index: {}]  }
   0x1   :  { %13 = vsyncpa [#allocation5], 0  ;;  %s35_s26 = sshll.u32 %s625_s3, 4  ;;  %s550_s27 = smov [#allocation4]   ;;  %s36_s26 = int_to_ptr.hbm [resolvable:$true] %s35_s26 }
   0x2   :  { %s37_s28 = sshll.u32 %s550_s27, 4  ;;  %s20_s8 = sshll.u32 %s623_s1, 4  ;;  %s38_s28 = int_to_ptr.vmem [resolvable:$true] %s37_s28  ;;  %s21_s8 = int_to_ptr.hbm [resolvable:$true] %s20_s8 }
   0x3   :  { %s551_s9 = smov 64   ;;  %s552_s10 = smov 4  }
   0x4   :  { %43 = dma.hbm_to_vmem [thread:$0]  %s36_s26, 1024, %s38_s28, [#allocation5], %s551_s9, %s551_s9, %s552_s10  }
   0x5   :  { %s553_s11 = smov [#allocation2]   ;;  %s50_s15 = sshll.u32 %s627_s5, 4  ;;  %s51_s15 = int_to_ptr.hbm [resolvable:$true] %s50_s15 }
   0x6   :  { %s22_s12 = sshll.u32 %s553_s11, 4  ;;  %s554_s3 = smov [#allocation6]   ;;  %s23_s12 = int_to_ptr.vmem [resolvable:$true] %s22_s12 }
   0x7   :  { %28 = dma.hbm_to_vmem [thread:$0]  %s21_s8, 1024, %s23_s12, [#allocation3], %s551_s9, %s551_s9, %s552_s10  }
   0x8   :  { %s52_s16 = sshll.u32 %s554_s3, 4  ;;  %s53_s16 = int_to_ptr.vmem [resolvable:$true] %s52_s16 }
   0x9   :  { %58 = dma.hbm_to_vmem [thread:$0]  %s51_s15, 1024, %s53_s16, [#allocation5], %s551_s9, %s551_s9, %s552_s10  }
   0xa   :  { %546 = dma.done.wait [#allocation3], 1024  }
   0xb   :  { %547 = vsyncadd [#allocation3], 4294966272 }
   0xc   :  { %548 = dma.done.wait [#allocation5], 2048  }
   0xd   :  { %549 = vsyncadd [#allocation5], 4294965248  ;;  %v449_v0 = vld [vmem:[#allocation2 + $0x38] sm:$0xff]  ;;  %v448_v1 = vld [vmem:[#allocation2 + $0x30] sm:$0xff] }
   0xe   :  { %149 = vmatpush.bf16.msra.mxu0 %v449_v0  ;;  %v457_v2 = vld [vmem:[#allocation4 + $0x38] sm:$0xff]  ;;  %v456_v3 = vld [vmem:[#allocation4 + $0x30] sm:$0xff]  ;;  %v447_v4 = vld [vmem:[#allocation2 + $0x28] sm:$0xff] }
   0xf   :  { %234 = vmatpush.bf16.msra.mxu1 %v457_v2  ;;  %v455_v5 = vld [vmem:[#allocation4 + $0x28] sm:$0xff]  ;;  %v446_v6 = vld [vmem:[#allocation2 + $0x20] sm:$0xff]  ;;  %v445_v8 = vld [vmem:[#allocation2 + $0x18] sm:$0xff] }
  0x10   :  { %v454_v7 = vld [vmem:[#allocation4 + $0x20] sm:$0xff]  ;;  %v444_v9 = vld [vmem:[#allocation2 + $0x10] sm:$0xff]  ;;  %v443_v10 = vld [vmem:[#allocation2 + $0x8] sm:$0xff] }
  0x11   :  { %v442_v11 = vld [vmem:[#allocation2] sm:$0xff]  ;;  %v453_v13 = vld [vmem:[#allocation4 + $0x18] sm:$0xff]  ;;  %v452_v14 = vld [vmem:[#allocation4 + $0x10] sm:$0xff] }
  0x12   :  { %150 = vmatpush.bf16.msra.mxu0 %v448_v1  ;;  %v441_v12 = vld [vmem:[%s622_s0] sm:$0xff]  ;;  %v451_v15 = vld [vmem:[#allocation4 + $0x8] sm:$0xff]  ;;  %v465_v17 = vld [vmem:[#allocation6 + $0x38] sm:$0xff] }
  0x13   :  { %235 = vmatpush.bf16.msra.mxu1 %v456_v3  ;;  %v450_v16 = vld [vmem:[#allocation4] sm:$0xff]  ;;  %319 = vmatpush.bf16.msra.mxu2 %v465_v17  ;;  %v464_v18 = vld [vmem:[#allocation6 + $0x30] sm:$0xff]  ;;  %v463_v19 = vld [vmem:[#allocation6 + $0x28] sm:$0xff] }
  0x14   :  { %v462_v20 = vld [vmem:[#allocation6 + $0x20] sm:$0xff]  ;;  %v461_v29 = vld [vmem:[#allocation6 + $0x18] sm:$0xff]  ;;  %v460_v30 = vld [vmem:[#allocation6 + $0x10] sm:$0xff] }
  0x15   :  { %v471_v22 = vld [vmem:[%s624_s2] ss:$0 sm:$0xff]  ;;  %v459_v31 = vld [vmem:[#allocation6 + $0x8] sm:$0xff] }
  0x16   :  { %151 = vmatpush.bf16.msra.mxu0 %v447_v4  ;;  %v458_v32 = vld [vmem:[#allocation6] sm:$0xff] }
  0x17   :  { %236 = vmatpush.bf16.msra.mxu1 %v455_v5  ;;  %320 = vmatpush.bf16.msra.mxu2 %v464_v18  ;;  %v472_v34 = vld [vmem:[%s626_s4] ss:$0 sm:$0xff] }
  0x18   :  { %v473_v41 = vld [vmem:[%s628_s6] ss:$0 sm:$0xff] }
  0x1a   :  { %152 = vmatpush.bf16.msra.mxu0 %v446_v6 }
  0x1b   :  { %237 = vmatpush.bf16.msra.mxu1 %v454_v7  ;;  %321 = vmatpush.bf16.msra.mxu2 %v463_v19 }
  0x1e   :  { %153 = vmatpush.bf16.msra.mxu0 %v445_v8 }
  0x1f   :  { %238 = vmatpush.bf16.msra.mxu1 %v453_v13  ;;  %322 = vmatpush.bf16.msra.mxu2 %v462_v20 }
  0x22   :  { %154 = vmatpush.bf16.msra.mxu0 %v444_v9 }
  0x23   :  { %239 = vmatpush.bf16.msra.mxu1 %v452_v14  ;;  %323 = vmatpush.bf16.msra.mxu2 %v461_v29 }
  0x26   :  { %155 = vmatpush.bf16.msra.mxu0 %v443_v10 }
  0x27   :  { %240 = vmatpush.bf16.msra.mxu1 %v451_v15  ;;  %324 = vmatpush.bf16.msra.mxu2 %v460_v30 }
  0x2a   :  { %156 = vmatpush.bf16.msra.mxu0 %v442_v11 }
  0x2b   :  { %241 = vmatpush.bf16.msra.mxu1 %v450_v16  ;;  %325 = vmatpush.bf16.msra.mxu2 %v459_v31 }
  0x2d   :  { %157 = vmatmul.bf16.vlgmr.msra.gmra.mxu0 %v441_v12 }
  0x2f   :  { %326 = vmatpush.bf16.msra.mxu2 %v458_v32 }
  0xaa   :  { %v158_v21 = vpop.f32.mrf.mxu0 }
  0xab   :  { %v159_v23 = vadd.f32 %v471_v22, %v158_v21 }
  0xad   :  { %v163_v26 = vmax.f32 %v159_v23, 0.0 }
  0xb2   :  { %v160_v24 = vpop.f32.mrf.mxu0 }
  0xb3   :  { %v161_v25 = vadd.f32 %v471_v22, %v160_v24 }
  0xb5   :  { %v164_v27 = vmax.f32 %v161_v25, 0.0 }
  0xb7   :  { %v182_v28 = vpack.c.bf16 %v164_v27, %v163_v26 }
  0xb9   :  { %242 = vmatmul.bf16.vlgmr.msra.gmra.mxu1 %v182_v28 }
 0x136   :  { %v243_v33 = vpop.f32.mrf.mxu1 }
 0x137   :  { %v244_v35 = vadd.f32 %v472_v34, %v243_v33 }
 0x139   :  { %v248_v38 = vmax.f32 %v244_v35, 0.0 }
 0x13e   :  { %v245_v36 = vpop.f32.mrf.mxu1 }
 0x13f   :  { %v246_v37 = vadd.f32 %v472_v34, %v245_v36 }
 0x141   :  { %v249_v39 = vmax.f32 %v246_v37, 0.0 }
 0x143   :  { %v267_v40 = vpack.c.bf16 %v249_v39, %v248_v38 }
 0x145   :  { %327 = vmatmul.bf16.vlgmr.msra.gmra.mxu2 %v267_v40 }
 0x1c8   :  { %v328_v42 = vpop.f32.mrf.mxu2 }
 0x1c9   :  { %v329_v43 = vadd.f32 %v473_v41, %v328_v42 }
 0x1cb   :  { %333 = vst [vmem:[%s629_s7] sm:$0xff] %v329_v43 }
 0x1d0   :  { %v330_v44 = vpop.f32.mrf.mxu2 }
 0x1d1   :  { %v331_v45 = vadd.f32 %v473_v41, %v330_v44 }
 0x1d3   :  { %334 = vst [vmem:[%s629_s7 + $0x8] sm:$0xff] %v331_v45 }
 0x1d4   :  { %339 = vsyncpa [#allocation3], 1 }
 0x1d5   :  { %340 = vsyncpa [#allocation5], 1 }

</bundles_post_ra>
